<compile_context>
chip_gen: v6e
topology: v6e:2x2x1
jax: 0.10.0
libtpu: 0.0.40
codegen_flags: <defaults>
</compile_context>

<pallas_src>
import functools
import math

import jax
import jax.numpy as jnp
from jax import lax
from jax.experimental import pallas as pl
from jax.experimental.pallas import tpu as pltpu


def _round_up(a: int, b: int) -> int:
    return (a + b - 1) // b * b


# ---------------------------------------------------------------------------
# Per-chip tiling / VMEM configuration.
# ---------------------------------------------------------------------------
def _chip_config():
    kind = ""
    try:
        kind = jax.devices()[0].device_kind.lower()
    except Exception:
        pass
    if "v5 lite" in kind or "v5e" in kind or "v5lite" in kind:
        # 197 TF/s bf16 vs ~0.8 TB/s HBM -> TM=256 is already near the balance
        # point.  128x128 MXU -> 128-lane alignment.  Physical VMEM 128 MiB.
        return dict(tm=256, tk=512, lane=128, vmem_budget=96 << 20,
                    vmem_cap=120 << 20, two_cores=False)
    if "v6" in kind:
        # 918 TF/s vs ~1.3 TB/s -> need TM ~ 1024 flops/weight-byte to be
        # MXU-bound.  256x256 MXU -> 256-lane alignment.  Physical VMEM 128 MiB.
        return dict(tm=1024, tk=512, lane=256, vmem_budget=100 << 20,
                    vmem_cap=120 << 20, two_cores=False)
    if "v7" in kind:
        # 64 MiB VMEM / TensorCore, 2 TCs share HBM: smaller TM, tight budget,
        # keep >= 2 M tiles so both cores get work on the "parallel" axis.
        return dict(tm=512, tk=512, lane=256, vmem_budget=44 << 20,
                    vmem_cap=56 << 20, two_cores=True)
    # Unknown TPU generation: conservative defaults that fit everywhere.
    return dict(tm=512, tk=512, lane=128, vmem_budget=40 << 20,
                vmem_cap=56 << 20, two_cores=False)


# ---------------------------------------------------------------------------
# Kernel
# ---------------------------------------------------------------------------
def _linear_gelu_ln_kernel(x_ref, w_ref, b_ref, g_ref, beta_ref, o_ref,
                           *scratch, n_valid: int, n_pad: int, eps: float):
    """y = LayerNorm(GELU(x @ W + b)); fp32 accumulation + fp32 epilogue.

    x_ref : (TM, TK)      activation tile
    w_ref : (TK, N_pad)   weight tile, pre-transposed to (K, N) layout
    o_ref : (TM, N_pad)   output tile, resident across the K grid axis
    scratch: optional fp32 accumulator; for f32 outputs the output block
             itself is used as the accumulator (saves TM*N_pad*4 B of VMEM).
    """
    acc_ref = scratch[0] if scratch else o_ref
    k = pl.program_id(1)

    partial_acc = jnp.dot(x_ref[...], w_ref[...],
                          preferred_element_type=jnp.float32)

    @pl.when(k == 0)
    def _():
        acc_ref[...] = partial_acc.astype(acc_ref.dtype)   # no zero-init pass

    @pl.when(k != 0)
    def _():
        acc_ref[...] += partial_acc.astype(acc_ref.dtype)

    # Epilogue only once per M tile, on the final K step.
    @pl.when(k == pl.num_programs(1) - 1)
    def _():
        y = acc_ref[...].astype(jnp.float32) + b_ref[...].astype(jnp.float32)
        # Exact erf-based GELU (torch.nn.GELU default).
        y = 0.5 * y * (1.0 + lax.erf(y * (1.0 / math.sqrt(2.0))))

        # LayerNorm over the *real* out_features (mask out lane padding).
        if n_pad != n_valid:
            col = lax.broadcasted_iota(jnp.int32, y.shape, 1)
            y = jnp.where(col < n_valid, y, 0.0)

        inv_n = 1.0 / float(n_valid)
        mean = jnp.sum(y, axis=-1, keepdims=True) * inv_n
        mean_sq = jnp.sum(y * y, axis=-1, keepdims=True) * inv_n
        var = jnp.maximum(mean_sq - mean * mean, 0.0)      # single-pass variance
        normed = (y - mean) * lax.rsqrt(var + eps)
        out = (normed * g_ref[...].astype(jnp.float32)
               + beta_ref[...].astype(jnp.float32))
        o_ref[...] = out.astype(o_ref.dtype)


# ---------------------------------------------------------------------------
# Parameter preparation (hoisted out of the per-call path).
# ---------------------------------------------------------------------------
def prepare_params(weight, bias, ln_weight, ln_bias, *, cfg=None):
    """Pad + transpose the parameters ONCE.

    weight: (out_features, in_features) -- torch nn.Linear layout.
    Returns (w_t, bias2d, gamma2d, beta2d, n_valid, tk) where
      w_t is (K_pad, N_pad): the kernel contracts the sublane dim of the RHS,
      so no per-tile transpose is needed in the steady state.
    """
    cfg = cfg or _chip_config()
    N, K = weight.shape
    N_pad = _round_up(N, cfg["lane"])       # lane-dense stores; 256 on v6e/v7x
    tk = cfg["tk"]
    if cfg["two_cores"] and N_pad >= 8192:  # v7x: keep w + acc + out under budget
        tk = 256
    tk = min(tk, _round_up(K, 128))
    K_pad = _round_up(K, tk)

    w_t = jnp.asarray(jnp.pad(weight, ((0, N_pad - N), (0, K_pad - K))).T)
    b2d = jnp.pad(bias, (0, N_pad - N)).reshape(1, N_pad)
    g2d = jnp.pad(ln_weight, (0, N_pad - N), constant_values=1.0).reshape(1, N_pad)
    beta2d = jnp.pad(ln_bias, (0, N_pad - N)).reshape(1, N_pad)
    return w_t, b2d, g2d, beta2d, N, tk


def _vmem_footprint(tm, tk, n_pad, in_isz, w_isz, out_isz, use_out_as_acc):
    x_b = 2 * tm * tk * in_isz                 # double-buffered activation tile
    w_b = 2 * tk * n_pad * w_isz               # double-buffered weight tile
    o_b = 2 * tm * n_pad * out_isz             # double-buffered output tile
    acc_b = 0 if use_out_as_acc else tm * n_pad * 4
    epi_b = 2 * tm * n_pad * 4                 # fp32 epilogue temporaries
    vec_b = 3 * 2 * n_pad * 4                  # bias / gamma / beta
    return x_b + w_b + o_b + acc_b + epi_b + vec_b


# ---------------------------------------------------------------------------
# Forward pass.
# ---------------------------------------------------------------------------
def linear_gelu_layernorm_prepared(x, params, *, eps=1e-6, tm=None):
    w_t, b2d, g2d, beta2d, n_valid, TK = params
    cfg = _chip_config()

    orig_shape = x.shape
    K = orig_shape[-1]
    K_pad, N_pad = w_t.shape
    M = int(math.prod(orig_shape[:-1])) if len(orig_shape) > 1 else 1

    in_isz = jnp.dtype(x.dtype).itemsize
    w_isz = jnp.dtype(w_t.dtype).itemsize
    out_dtype = x.dtype
    out_isz = jnp.dtype(out_dtype).itemsize
    use_out_as_acc = out_dtype == jnp.float32

    TM = min(tm or cfg["tm"], _round_up(M, 8))

    # v7x: make sure both TensorCores get at least one M tile.
    if cfg["two_cores"] and M >= 16:
        while TM > 8 and -(-M // TM) < 2:
            TM = max(8, _round_up(TM // 2, 8))

    def fits(tm_, tk_):
        return _vmem_footprint(tm_, tk_, N_pad, in_isz, w_isz, out_isz,
                               use_out_as_acc) <= cfg["vmem_budget"]

    # Shrink TK first (preserves flops/weight-byte), then TM, until it fits.
    while (TK > 128 and not fits(TM, TK)
           and (TK // 2) % 128 == 0 and K_pad % (TK // 2) == 0):
        TK //= 2
    while TM > 8 and not fits(TM, TK):
        TM = max(8, _round_up(TM // 2, 8))

    M_pad = _round_up(M, TM)
    x2d = x.reshape(M, K)
    if (M_pad, K_pad) != (M, K):
        x2d = jnp.pad(x2d, ((0, M_pad - M), (0, K_pad - K)))

    grid = (M_pad // TM, K_pad // TK)
    n_m_tiles = grid[0]

    footprint = _vmem_footprint(TM, TK, N_pad, in_isz, w_isz, out_isz,
                                use_out_as_acc)
    vmem_limit = int(min(cfg["vmem_cap"], max(footprint + (4 << 20), 32 << 20)))

    cost = pl.CostEstimate(
        flops=2 * M_pad * N_pad * K_pad,
        transcendentals=2 * M_pad * N_pad,                  # erf + rsqrt
        bytes_accessed=(M_pad * K_pad * in_isz              # x read once
                        + n_m_tiles * K_pad * N_pad * w_isz  # weight per M tile
                        + M_pad * N_pad * out_isz),
    )

    kernel = functools.partial(_linear_gelu_ln_kernel,
                               n_valid=n_valid, n_pad=N_pad, eps=eps)
    scratch_shapes = ([] if use_out_as_acc
                      else [pltpu.VMEM((TM, N_pad), jnp.float32)])

    out2d = pl.pallas_call(
        kernel,
        out_shape=jax.ShapeDtypeStruct((M_pad, N_pad), out_dtype),
        grid_spec=pltpu.PrefetchScalarGridSpec(
            num_scalar_prefetch=0,
            grid=grid,
            in_specs=[
                pl.BlockSpec((TM, TK), lambda i, k: (i, k)),      # x
                pl.BlockSpec((TK, N_pad), lambda i, k: (k, 0)),   # weight (K, N)
                pl.BlockSpec((1, N_pad), lambda i, k: (0, 0)),    # bias
                pl.BlockSpec((1, N_pad), lambda i, k: (0, 0)),    # LN gamma
                pl.BlockSpec((1, N_pad), lambda i, k: (0, 0)),    # LN beta
            ],
            out_specs=pl.BlockSpec((TM, N_pad), lambda i, k: (i, 0)),
            scratch_shapes=scratch_shapes,
        ),
        compiler_params=pltpu.CompilerParams(
            dimension_semantics=("parallel", "arbitrary"),
            vmem_limit_bytes=vmem_limit,
        ),
        cost_estimate=cost,
    )(x2d, w_t, b2d, g2d, beta2d)

    return out2d[:M, :n_valid].reshape(*orig_shape[:-1], n_valid)


def linear_gelu_layernorm(x, weight, bias, ln_weight, ln_bias, *, eps=1e-6):
    """One-shot convenience wrapper.  For repeated forward passes with the
    same parameters, call `prepare_params` once and reuse the result."""
    params = prepare_params(weight, bias, ln_weight, ln_bias)
    return linear_gelu_layernorm_prepared(x, params, eps=eps)


if __name__ == "__main__":
    key = jax.random.PRNGKey(0)
    batch, seq, in_features, out_features = 2, 8, 32, 32

    k_x, k_w = jax.random.split(key)
    x = jax.random.normal(k_x, (batch, seq, in_features), dtype=jnp.float32)

    # Deterministic parameters mirroring the PyTorch module's __init__:
    #   nn.init.normal_(linear.weight, std=sqrt(2/in_features)); bias = 0
    #   LayerNorm: weight = 1, bias = 0
    weight = jax.random.normal(k_w, (out_features, in_features),
                               dtype=jnp.float32) * math.sqrt(2.0 / in_features)
    bias = jnp.zeros((out_features,), dtype=jnp.float32)
    ln_weight = jnp.ones((out_features,), dtype=jnp.float32)
    ln_bias = jnp.zeros((out_features,), dtype=jnp.float32)

    # Hoisted parameter prep (pad + transpose once), then the Pallas call.
    params = prepare_params(weight, bias, ln_weight, ln_bias)
    out = linear_gelu_layernorm_prepared(x, params)
    jax.block_until_ready(out)

    # Pure-JAX reference.
    y = x @ weight.T + bias
    y = 0.5 * y * (1.0 + lax.erf(y / math.sqrt(2.0)))
    mu = jnp.mean(y, axis=-1, keepdims=True)
    var = jnp.mean((y - mu) ** 2, axis=-1, keepdims=True)
    ref = (y - mu) * lax.rsqrt(var + 1e-6) * ln_weight + ln_bias

    assert out.shape == ref.shape
    assert jnp.allclose(out, ref, atol=1e-4, rtol=1e-4), \
        float(jnp.max(jnp.abs(out - ref)))

    print("KERNEL_OK")
</pallas_src>

<mosaic_0001>
module attributes {stable_mosaic.version = 11 : i64} {
  func.func @_linear_gelu_ln_kernel(%arg0: i32, %arg1: i32, %arg2: memref<16x128xf32, #tpu.memory_space<vmem>>, %arg3: memref<128x128xf32, #tpu.memory_space<vmem>>, %arg4: memref<1x128xf32, #tpu.memory_space<vmem>>, %arg5: memref<1x128xf32, #tpu.memory_space<vmem>>, %arg6: memref<1x128xf32, #tpu.memory_space<vmem>>, %arg7: memref<16x128xf32, #tpu.memory_space<vmem>>) attributes {dimension_semantics = [#tpu.dimension_semantics<parallel>, #tpu.dimension_semantics<arbitrary>], iteration_bounds = array<i64: 1, 1>, scalar_prefetch = 0 : i64, scratch_operands = 0 : i64, tpu.core_type = #tpu.core_type<tc>, window_params = [{transform_indices = @transform_0, window_bounds = array<i64: 16, 128>}, {transform_indices = @transform_1, window_bounds = array<i64: 128, 128>}, {pipeline_mode = #tpu.pipeline_mode<synchronous>, transform_indices = @transform_2, window_bounds = array<i64: 1, 128>}, {pipeline_mode = #tpu.pipeline_mode<synchronous>, transform_indices = @transform_3, window_bounds = array<i64: 1, 128>}, {pipeline_mode = #tpu.pipeline_mode<synchronous>, transform_indices = @transform_4, window_bounds = array<i64: 1, 128>}, {transform_indices = @transform_5, window_bounds = array<i64: 16, 128>}]} {
    %c0 = arith.constant 0 : index
    %c0_0 = arith.constant 0 : index
    %0 = vector.load %arg2[%c0, %c0_0] : memref<16x128xf32, #tpu.memory_space<vmem>>, vector<16x128xf32>
    %c0_1 = arith.constant 0 : index
    %c0_2 = arith.constant 0 : index
    %1 = vector.load %arg3[%c0_1, %c0_2] : memref<128x128xf32, #tpu.memory_space<vmem>>, vector<128x128xf32>
    %cst = arith.constant dense<0.000000e+00> : vector<16x128xf32>
    %2 = tpu.matmul %0, %1, %cst {dimension_numbers = #tpu.dot_dimension_numbers<[1], [0], [0], [1], [0, 0, 1, 1], [], []>} : vector<16x128xf32>, vector<128x128xf32>, vector<16x128xf32> -> vector<16x128xf32>
    %c0_i32 = arith.constant 0 : i32
    %3 = arith.cmpi eq, %arg1, %c0_i32 : i32
    %4 = arith.extui %3 : i1 to i32
    %c0_i32_3 = arith.constant 0 : i32
    %5 = arith.cmpi ne, %4, %c0_i32_3 : i32
    scf.if %5 {
      %c0_8 = arith.constant 0 : index
      %c0_9 = arith.constant 0 : index
      %12 = vector.load %arg7[%c0_8, %c0_9] : memref<16x128xf32, #tpu.memory_space<vmem>>, vector<16x128xf32>
      tpu.vector_store %arg7[%c0_8, %c0_9], %2 {strides = array<i32>} : memref<16x128xf32, #tpu.memory_space<vmem>>, vector<16x128xf32>,
    } else {
    }
    %c0_i32_4 = arith.constant 0 : i32
    %6 = arith.cmpi ne, %arg1, %c0_i32_4 : i32
    %7 = arith.extui %6 : i1 to i32
    %c0_i32_5 = arith.constant 0 : i32
    %8 = arith.cmpi ne, %7, %c0_i32_5 : i32
    scf.if %8 {
      %c0_8 = arith.constant 0 : index
      %c0_9 = arith.constant 0 : index
      %12 = vector.load %arg7[%c0_8, %c0_9] : memref<16x128xf32, #tpu.memory_space<vmem>>, vector<16x128xf32>
      %13 = arith.addf %12, %2 : vector<16x128xf32>
      %c0_10 = arith.constant 0 : index
      %c0_11 = arith.constant 0 : index
      %14 = vector.load %arg7[%c0_10, %c0_11] : memref<16x128xf32, #tpu.memory_space<vmem>>, vector<16x128xf32>
      tpu.vector_store %arg7[%c0_10, %c0_11], %13 {strides = array<i32>} : memref<16x128xf32, #tpu.memory_space<vmem>>, vector<16x128xf32>,
    } else {
    }
    %c0_i32_6 = arith.constant 0 : i32
    %9 = arith.cmpi eq, %arg1, %c0_i32_6 : i32
    %10 = arith.extui %9 : i1 to i32
    %c0_i32_7 = arith.constant 0 : i32
    %11 = arith.cmpi ne, %10, %c0_i32_7 : i32
    scf.if %11 {
      %c0_8 = arith.constant 0 : index
      %c0_9 = arith.constant 0 : index
      %12 = vector.load %arg7[%c0_8, %c0_9] : memref<16x128xf32, #tpu.memory_space<vmem>>, vector<16x128xf32>
      %c0_10 = arith.constant 0 : index
      %c0_11 = arith.constant 0 : index
      %13 = vector.load %arg4[%c0_10, %c0_11] : memref<1x128xf32, #tpu.memory_space<vmem>>, vector<1x128xf32>
      %14 = vector.broadcast %13 : vector<1x128xf32> to vector<16x128xf32>
      %15 = arith.addf %12, %14 : vector<16x128xf32>
      %cst_12 = arith.constant 5.000000e-01 : f32
      %16 = vector.broadcast %cst_12 : f32 to vector<16x128xf32>
      %17 = arith.mulf %16, %15 : vector<16x128xf32>
      %cst_13 = arith.constant 0.707106769 : f32
      %18 = vector.broadcast %cst_13 : f32 to vector<16x128xf32>
      %19 = arith.mulf %15, %18 : vector<16x128xf32>
      %20 = math.erf %19 : vector<16x128xf32>
      %cst_14 = arith.constant 1.000000e+00 : f32
      %21 = vector.broadcast %cst_14 : f32 to vector<16x128xf32>
      %22 = arith.addf %21, %20 : vector<16x128xf32>
      %23 = arith.mulf %17, %22 : vector<16x128xf32>
      %24 = tpu.iota {dimensions = array<i32: 1>} : vector<16x128xi32>
      %c32_i32 = arith.constant 32 : i32
      %25 = vector.broadcast %c32_i32 : i32 to vector<16x128xi32>
      %26 = arith.cmpi slt, %24, %25 : vector<16x128xi32>
      %cst_15 = arith.constant 0.000000e+00 : f32
      %27 = vector.broadcast %cst_15 : f32 to vector<16x128xf32>
      %28 = arith.select %26, %23, %27 : vector<16x128xi1>, vector<16x128xf32>
      %cst_16 = arith.constant dense<0.000000e+00> : vector<16xf32>
      %29 = vector.multi_reduction <add>, %28, %cst_16 [1] : vector<16x128xf32> to vector<16xf32>
      %30 = vector.shape_cast %29 : vector<16xf32> to vector<16x1xf32>
      %cst_17 = arith.constant 3.125000e-02 : f32
      %31 = vector.broadcast %cst_17 : f32 to vector<16x1xf32>
      %32 = arith.mulf %30, %31 : vector<16x1xf32>
      %33 = arith.mulf %28, %28 : vector<16x128xf32>
      %cst_18 = arith.constant dense<0.000000e+00> : vector<16xf32>
      %34 = vector.multi_reduction <add>, %33, %cst_18 [1] : vector<16x128xf32> to vector<16xf32>
      %35 = vector.shape_cast %34 : vector<16xf32> to vector<16x1xf32>
      %cst_19 = arith.constant 3.125000e-02 : f32
      %36 = vector.broadcast %cst_19 : f32 to vector<16x1xf32>
      %37 = arith.mulf %35, %36 : vector<16x1xf32>
      %38 = arith.mulf %32, %32 : vector<16x1xf32>
      %39 = arith.subf %37, %38 : vector<16x1xf32>
      %cst_20 = arith.constant 0.000000e+00 : f32
      %40 = vector.broadcast %cst_20 : f32 to vector<16x1xf32>
      %41 = arith.maximumf %39, %40 : vector<16x1xf32>
      %42 = vector.broadcast %32 : vector<16x1xf32> to vector<16x128xf32>
      %43 = arith.subf %28, %42 : vector<16x128xf32>
      %cst_21 = arith.constant 9.99999997E-7 : f32
      %44 = vector.broadcast %cst_21 : f32 to vector<16x1xf32>
      %45 = arith.addf %41, %44 : vector<16x1xf32>
      %46 = math.rsqrt %45 : vector<16x1xf32>
      %47 = vector.broadcast %46 : vector<16x1xf32> to vector<16x128xf32>
      %48 = arith.mulf %43, %47 : vector<16x128xf32>
      %c0_22 = arith.constant 0 : index
      %c0_23 = arith.constant 0 : index
      %49 = vector.load %arg5[%c0_22, %c0_23] : memref<1x128xf32, #tpu.memory_space<vmem>>, vector<1x128xf32>
      %50 = vector.broadcast %49 : vector<1x128xf32> to vector<16x128xf32>
      %51 = arith.mulf %48, %50 : vector<16x128xf32>
      %c0_24 = arith.constant 0 : index
      %c0_25 = arith.constant 0 : index
      %52 = vector.load %arg6[%c0_24, %c0_25] : memref<1x128xf32, #tpu.memory_space<vmem>>, vector<1x128xf32>
      %53 = vector.broadcast %52 : vector<1x128xf32> to vector<16x128xf32>
      %54 = arith.addf %51, %53 : vector<16x128xf32>
      %c0_26 = arith.constant 0 : index
      %c0_27 = arith.constant 0 : index
      %55 = vector.load %arg7[%c0_26, %c0_27] : memref<16x128xf32, #tpu.memory_space<vmem>>, vector<16x128xf32>
      tpu.vector_store %arg7[%c0_26, %c0_27], %54 {strides = array<i32>} : memref<16x128xf32, #tpu.memory_space<vmem>>, vector<16x128xf32>,
    } else {
    }
    return
  }
  func.func @transform_0(%arg0: i32, %arg1: i32) -> (i32, i32) {
    %c0_i32 = arith.constant 0 : i32
    return %arg0, %arg1 : i32, i32
  }
  func.func @transform_1(%arg0: i32, %arg1: i32) -> (i32, i32) {
    %c0_i32 = arith.constant 0 : i32
    %c0_i32_0 = arith.constant 0 : i32
    return %arg1, %c0_i32 : i32, i32
  }
  func.func @transform_2(%arg0: i32, %arg1: i32) -> (i32, i32) {
    %c0_i32 = arith.constant 0 : i32
    %c0_i32_0 = arith.constant 0 : i32
    %c0_i32_1 = arith.constant 0 : i32
    return %c0_i32, %c0_i32_0 : i32, i32
  }
  func.func @transform_3(%arg0: i32, %arg1: i32) -> (i32, i32) {
    %c0_i32 = arith.constant 0 : i32
    %c0_i32_0 = arith.constant 0 : i32
    %c0_i32_1 = arith.constant 0 : i32
    return %c0_i32, %c0_i32_0 : i32, i32
  }
  func.func @transform_4(%arg0: i32, %arg1: i32) -> (i32, i32) {
    %c0_i32 = arith.constant 0 : i32
    %c0_i32_0 = arith.constant 0 : i32
    %c0_i32_1 = arith.constant 0 : i32
    return %c0_i32, %c0_i32_0 : i32, i32
  }
  func.func @transform_5(%arg0: i32, %arg1: i32) -> (i32, i32) {
    %c0_i32 = arith.constant 0 : i32
    %c0_i32_0 = arith.constant 0 : i32
    return %arg0, %c0_i32 : i32, i32
  }
}

</mosaic_0001>

<bundles_post_ra>
// kernel: tpu_custom_call.1
= control target key start
LH: loop header
LB: loop body
LE: loop exit
PB: predicated region body
PF: predicated region fallthrough
CT: control target
= control target key end

     0   :  { %10 = vsyncpa [#allocation3], 0  ;;  %s450_s0 = inlined_call_operand.hbm [shape: f32[16,128], index: 0, kind: input, shape index: {}]   ;;  %s451_s1 = inlined_call_operand.hbm [shape: f32[128,128], index: 1, kind: input, shape index: {}]   ;;  %s452_s2 = inlined_call_operand.vmem [shape: f32[1,128], index: 2, kind: input, shape index: {}]   ;;  %s453_s3 = inlined_call_operand.vmem [shape: f32[1,128], index: 3, kind: input, shape index: {}]   ;;  %s454_s4 = inlined_call_operand.vmem [shape: f32[1,128], index: 4, kind: input, shape index: {}]   ;;  %s455_s5 = inlined_call_operand.hbm [shape: f32[16,128], index: 5, kind: output, shape index: {}]  }
   0x1   :  { %11 = vsyncpa [#allocation6], 0 }
   0x2   :  { %12 = vsyncpa [#allocation4], 0  ;;  %s388_s18 = smov [#allocation2]  }
   0x3   :  { %s18_s19 = sshll.u32 %s388_s18, 4  ;;  %s19_s19 = int_to_ptr.vmem [resolvable:$true] %s18_s19 }
   0x4   :  { %s330_s20 = scalar_lea.vmem %s19_s19, 256  ;;  %p335_p1 = scmp.lt.s32.totalorder %s19_s19, %s19_s19 }
   0x5   :  { %p331_p0 = scmp.ne.s32.totalorder %s19_s19, %s330_s20  ;;  %p336_p2 = scmp.lt.s32.totalorder %s330_s20, %s330_s20 }
   0x7   :  { %p337_p3 = por %p336_p2, %p335_p1 }
   0x9   :  { %p338_p4 = pnand %p337_p3, %p331_p0 }
   0xb   :  { %341 = shalt.err (!%p338_p4)
}
   0xc   :  { %s389_s21 = smov 128   ;;  %s390_s22 = smov 8  }
   0xd   :  { %24 = dma.hbm_to_vmem [thread:$0]  %s450_s0, 256, %s19_s19, [#allocation3], %s389_s21, %s389_s21, %s390_s22  }
   0xe   :  { %s391_s25 = smov [#allocation5]  }
   0xf   :  { %s30_s26 = sshll.u32 %s391_s25, 4  ;;  %s31_s26 = int_to_ptr.vmem [resolvable:$true] %s30_s26 }
  0x10   :  { %s350_s27 = scalar_lea.vmem %s31_s26, 2048  ;;  %p355_p6 = scmp.lt.s32.totalorder %s31_s26, %s31_s26 }
  0x11   :  { %p351_p5 = scmp.ne.s32.totalorder %s31_s26, %s350_s27  ;;  %p356_p7 = scmp.lt.s32.totalorder %s350_s27, %s350_s27 }
  0x13   :  { %p357_p8 = por %p356_p7, %p355_p6 }
  0x15   :  { %p358_p9 = pnand %p357_p8, %p351_p5 }
  0x17   :  { %361 = shalt.err (!%p358_p9)
}
  0x18   :  { %36 = dma.hbm_to_vmem [thread:$0]  %s451_s1, 2048, %s31_s26, [#allocation6], %s389_s21, %s389_s21, %s390_s22  }
  0x19   :  { %382 = dma.done.wait [#allocation3], 256  }
  0x1a   :  { %383 = vsyncadd [#allocation3], 4294967040 }
  0x1b   :  { %384 = dma.done.wait [#allocation6], 2048  }
  0x1c   :  { %385 = vsyncadd [#allocation6], 4294965248  ;;  %v66_v0 = vld [vmem:[#allocation5 + $0x78] sm:$0xff]  ;;  %v65_v1 = vld [vmem:[#allocation5 + $0x70] sm:$0xff]  ;;  %v182_v25 = vlaneseq  ;;  %s392_s8 = smov [#allocation7]  }
  0x1d   :  { %274 = vmatprep.subr.mxu0 %v66_v0  ;;  %v64_v2 = vld [vmem:[#allocation5 + $0x68] sm:$0xff]  ;;  %v63_v3 = vld [vmem:[#allocation5 + $0x60] sm:$0xff]  ;;  %v49_v4 = vld [vmem:[#allocation2] sm:$0xff]  ;;  %s240_s9 = sshll.u32 %s392_s8, 4  ;;  %s241_s9 = int_to_ptr.vmem [resolvable:$true] %s240_s9 }
  0x1e   :  { %275 = vmatpush3.msra.mxu0 %v66_v0  ;;  %v62_v5 = vld [vmem:[#allocation5 + $0x58] sm:$0xff]  ;;  %306 = vmatprep.mubr.f32.mxu0 %v49_v4  ;;  %v61_v6 = vld [vmem:[#allocation5 + $0x50] sm:$0xff]  ;;  %v60_v7 = vld [vmem:[#allocation5 + $0x48] sm:$0xff]  ;;  %v183_v29 = vand.u32 127, %v182_v25  ;;  %s362_s10 = scalar_lea.vmem %s241_s9, 256  ;;  %p367_p11 = scmp.lt.s32.totalorder %s241_s9, %s241_s9 }
  0x1f   :  { %276 = vmatprep.subr.mxu0 %v65_v1  ;;  %v59_v8 = vld [vmem:[#allocation5 + $0x40] sm:$0xff]  ;;  %v58_v9 = vld [vmem:[#allocation5 + $0x38] sm:$0xff]  ;;  %v57_v10 = vld [vmem:[#allocation5 + $0x30] sm:$0xff]  ;;  %p363_p10 = scmp.ne.s32.totalorder %s241_s9, %s362_s10  ;;  %p368_p12 = scmp.lt.s32.totalorder %s362_s10, %s362_s10 }
  0x20   :  { %277 = vmatpush3.msra.mxu0 %v65_v1  ;;  %v56_v11 = vld [vmem:[#allocation5 + $0x28] sm:$0xff]  ;;  %v55_v12 = vld [vmem:[#allocation5 + $0x20] sm:$0xff]  ;;  %v54_v13 = vld [vmem:[#allocation5 + $0x18] sm:$0xff]  ;;  %vm184_vm0 = vcmp.lt.s32.totalorder %v183_v29, 32 }
  0x21   :  { %278 = vmatprep.subr.mxu0 %v64_v2  ;;  %v53_v14 = vld [vmem:[#allocation5 + $0x10] sm:$0xff]  ;;  %v52_v15 = vld [vmem:[#allocation5 + $0x8] sm:$0xff]  ;;  %v51_v16 = vld [vmem:[#allocation5] sm:$0xff]  ;;  %p369_p13 = por %p368_p12, %p367_p11 }
  0x22   :  { %279 = vmatpush3.msra.mxu0 %v64_v2  ;;  %v50_v17 = vld [vmem:[#allocation2 + $0x8] sm:$0xff]  ;;  %v253_v18 = vld [vmem:[%s452_s2] ss:$0 sm:$0xff] }
  0x23   :  { %280 = vmatprep.subr.mxu0 %v63_v3  ;;  %v254_v57 = vld [vmem:[%s453_s3] ss:$0 sm:$0xff]  ;;  %p370_p0 = pnand %p369_p13, %p363_p10 }
  0x24   :  { %281 = vmatpush3.msra.mxu0 %v63_v3  ;;  %v255_v59 = vld [vmem:[%s454_s4] ss:$0 sm:$0xff] }
  0x25   :  { %282 = vmatprep.subr.mxu0 %v62_v5 }
  0x26   :  { %283 = vmatpush3.msra.mxu0 %v62_v5 }
  0x27   :  { %284 = vmatprep.subr.mxu0 %v61_v6 }
  0x28   :  { %285 = vmatpush3.msra.mxu0 %v61_v6 }
  0x29   :  { %286 = vmatprep.subr.mxu0 %v60_v7 }
  0x2a   :  { %287 = vmatpush3.msra.mxu0 %v60_v7 }
  0x2b   :  { %288 = vmatprep.subr.mxu0 %v59_v8 }
  0x2c   :  { %289 = vmatpush3.msra.mxu0 %v59_v8 }
  0x2d   :  { %290 = vmatprep.subr.mxu0 %v58_v9 }
  0x2e   :  { %291 = vmatpush3.msra.mxu0 %v58_v9 }
  0x2f   :  { %292 = vmatprep.subr.mxu0 %v57_v10 }
  0x30   :  { %293 = vmatpush3.msra.mxu0 %v57_v10 }
  0x31   :  { %294 = vmatprep.subr.mxu0 %v56_v11 }
  0x32   :  { %295 = vmatpush3.msra.mxu0 %v56_v11 }
  0x33   :  { %296 = vmatprep.subr.mxu0 %v55_v12 }
  0x34   :  { %297 = vmatpush3.msra.mxu0 %v55_v12 }
  0x35   :  { %298 = vmatprep.subr.mxu0 %v54_v13 }
  0x36   :  { %299 = vmatpush3.msra.mxu0 %v54_v13 }
  0x37   :  { %300 = vmatprep.subr.mxu0 %v53_v14 }
  0x38   :  { %301 = vmatpush3.msra.mxu0 %v53_v14 }
  0x39   :  { %302 = vmatprep.subr.mxu0 %v52_v15 }
  0x3a   :  { %303 = vmatpush3.msra.mxu0 %v52_v15 }
  0x3b   :  { %304 = vmatprep.subr.mxu0 %v51_v16 }
  0x3c   :  { %305 = vmatpush3.msra.mxu0 %v51_v16 }
  0x3d   :  { %307 = vmatmul.mubr.f32.vlgmr.msra.gmra.mxu0 %v50_v17 }
  0xfd   :  { %v308_v19 = vpop.f32.mrf.mxu0 }
  0xfe   :  { %v171_v20 = vadd.f32 %v308_v19, %v253_v18 }
  0xff   :  { %v133_v21 = vpop.f32.mrf.mxu0 }
 0x100   :  { %v170_v22 = vadd.f32 %v253_v18, %v133_v21  ;;  %v175_v23 = vmul.f32 0.70710677, %v171_v20  ;;  %v173_v32 = vmul.f32 0.5, %v171_v20 }
 0x102   :  { %v174_v24 = vmul.f32 0.70710677, %v170_v22  ;;  %314 = verf.f32 %v175_v23  ;;  %v172_v30 = vmul.f32 0.5, %v170_v22 }
 0x104   :  { %316 = verf.f32 %v174_v24 }
 0x10f   :  { %v315_v26 = vpop.eup %314 }
 0x110   :  { %v179_v27 = vadd.f32 1.0, %v315_v26 }
 0x111   :  { %v317_v28 = vpop.eup %316 }
 0x112   :  { %v178_v31 = vadd.f32 1.0, %v317_v28  ;;  %v181_v34 = vmul.f32 %v179_v27, %v173_v32 }
 0x114   :  { %v180_v33 = vmul.f32 %v178_v31, %v172_v30  ;;  %v186_v37 = vsel %vm184_vm0, %v181_v34, 0.0 }
 0x115   :  { %v194_v38 = vmul.f32 %v186_v37, %v186_v37 }
 0x116   :  { %v185_v35 = vsel %vm184_vm0, %v180_v33, 0.0 }
 0x117   :  { %187 = vadd.xlane.f32.xlu0 %v185_v35  ;;  %v193_v36 = vmul.f32 %v185_v35, %v185_v35 }
 0x119   :  { %195 = vadd.xlane.f32.xlu1 %v193_v36 }
 0x11b   :  { %189 = vadd.xlane.f32.xlu0 %v186_v37 }
 0x11d   :  { %197 = vadd.xlane.f32.xlu1 %v194_v38 }
 0x1a0   :  { %v188_v39 = vpop.xlane.xlu0 %187 }
 0x1a1   :  { %v191_v40 = vmul.f32 0.03125, %v188_v39 }
 0x1a2   :  { %v196_v41 = vpop.xlane.xlu1 %195 }
 0x1a3   :  { %v201_v42 = vmul.f32 %v191_v40, %v191_v40  ;;  %v199_v43 = vmul.f32 0.03125, %v196_v41  ;;  %v207_v55 = vsub.f32 %v185_v35, %v191_v40 }
 0x1a4   :  { %v190_v44 = vpop.xlane.xlu0 %189 }
 0x1a5   :  { %v203_v45 = vsub.f32 %v199_v43, %v201_v42  ;;  %v192_v46 = vmul.f32 0.03125, %v190_v44 }
 0x1a6   :  { %v198_v47 = vpop.xlane.xlu1 %197 }
 0x1a7   :  { %v205_v48 = vmax.f32 %v203_v45, 0.0  ;;  %v202_v49 = vmul.f32 %v192_v46, %v192_v46  ;;  %v200_v50 = vmul.f32 0.03125, %v198_v47  ;;  %v208_v60 = vsub.f32 %v186_v37, %v192_v46 }
 0x1a9   :  { %v209_v51 = vadd.f32 1e-06, %v205_v48  ;;  %v204_v52 = vsub.f32 %v200_v50, %v202_v49 }
 0x1ab   :  { %318 = vrsqrt.f32 %v209_v51  ;;  %v206_v53 = vmax.f32 %v204_v52, 0.0 }
 0x1ad   :  { %v210_v54 = vadd.f32 1e-06, %v206_v53 }
 0x1af   :  { %320 = vrsqrt.f32 %v210_v54 }
 0x1b8   :  { %v319_v56 = vpop.eup %318 }
 0x1b9   :  { %v213_v58 = vmul.f32 %v319_v56, %v207_v55 }
 0x1bb   :  { %v222_v61 = vmul.f32 %v254_v57, %v213_v58 }
 0x1bc   :  { %v321_v62 = vpop.eup %320 }
 0x1bd   :  { %v214_v63 = vmul.f32 %v321_v62, %v208_v60  ;;  %v231_v0 = vadd.f32 %v255_v59, %v222_v61 }
 0x1bf   :  { %v223_v1 = vmul.f32 %v254_v57, %v214_v63  ;;  %233 = vst [vmem:[#allocation7] sm:$0xff] %v231_v0 }
 0x1c1   :  { %v232_v2 = vadd.f32 %v255_v59, %v223_v1 }
 0x1c3   :  { %234 = vst [vmem:[#allocation7 + $0x8] sm:$0xff] %v232_v2 }
 0x1c4   :  { %373 = shalt.err (!%p370_p0)
}
 0x1c5   :  { %246 = dma.vmem_to_hbm [thread:$0]  %s241_s9, 256, %s455_s5, [#allocation4], %s389_s21, %s389_s21, %s390_s22  }
 0x1c6   :  { %386 = dma.done.wait [#allocation4], 256  }
 0x1c7   :  { %387 = vsyncadd [#allocation4], 4294967040 }
 0x1c8   :  { %250 = vsyncpa [#allocation3], 1 }
 0x1c9   :  { %251 = vsyncpa [#allocation6], 1 }
 0x1ca   :  { %252 = vsyncpa [#allocation4], 1 }

</bundles_post_ra>
